<compile_context>
chip_gen: v7x
topology: tpu7x:2x2x1
jax: 0.10.0
libtpu: 0.0.40
codegen_flags: <defaults>
</compile_context>

<pallas_src>
import functools

import jax
import jax.numpy as jnp
from jax import lax
from jax.experimental import pallas as pl
from jax.experimental.pallas import tpu as pltpu


def _fe_kernel(x_ref, w_ref, b_ref, o_ref, acc_ref):
    # grid = (B/tm, N/tn, K/tk); K (reduction) is innermost / "arbitrary".
    k = pl.program_id(2)

    @pl.when(k == 0)
    def _():
        acc_ref[...] = jnp.zeros_like(acc_ref)

    # x tile: (tm, tk), weight tile: (tn, tk).  Contract last dims of both
    # (rhs-transposed form) -> (tm, tn) on the MXU, no XLU transpose needed.
    acc_ref[...] += lax.dot_general(
        x_ref[...], w_ref[...],
        dimension_numbers=(((1,), (1,)), ((), ())),
        preferred_element_type=jnp.float32,
    )

    @pl.when(k == pl.num_programs(2) - 1)
    def _():
        o_ref[...] = (acc_ref[...] + b_ref[...].astype(jnp.float32)).astype(o_ref.dtype)


def _round_up(a, b):
    return (a + b - 1) // b * b


def _pick_tile(dim, align, candidates):
    """Pick a tile size: full (aligned) extent if it fits in the largest candidate,
    otherwise the candidate that minimizes zero-padding (ties -> larger tile)."""
    aligned = _round_up(dim, align)
    if aligned <= candidates[0]:
        return aligned
    best = candidates[0]
    best_pad = _round_up(dim, best) - dim
    for t in candidates[1:]:
        pad = _round_up(dim, t) - dim
        if pad < best_pad:
            best, best_pad = t, pad
    return best


def _pick_tiles(B, N, K):
    # Respect the (8, 128) layout constraint; grow tiles up to HBM-friendly sizes
    # while keeping padding waste small on N and K.
    tm = min(_round_up(B, 8), 256)
    tn = _pick_tile(N, 128, (512, 256, 128))
    tk = _pick_tile(K, 128, (2048, 1024, 512, 256, 128))
    return tm, tn, tk


@functools.partial(jax.jit, static_argnums=(4, 5, 6))
def feature_embed_forward(x, weight, mask_w, bias, num_patches, embed_dim,
                          compute_dtype=None):
    """x: (B, num_genes) -> (B, num_patches, embed_dim).

    weight, mask_w: (N, num_genes) with N = num_patches * embed_dim (nn.Linear layout,
    rows ordered as n = w * num_patches + c, matching torch).  bias: (N,).
    """
    B, K = x.shape
    N = weight.shape[0]
    assert weight.shape == (N, K) and mask_w.shape == (N, K)
    assert N == num_patches * embed_dim

    # Fold the static mask into the weight once -> single weight stream in the kernel.
    # Simultaneously fold the 'h (w c) -> h c w' permutation: reorder rows from
    # n = w*num_patches + c  to  n' = c*embed_dim + w, so the kernel output is already
    # in (patch, channel) order and the final reshape is a free contiguous view.
    wm = (weight * mask_w).reshape(embed_dim, num_patches, K)
    wm = wm.transpose(1, 0, 2).reshape(N, K)           # fuses with the multiply in XLA
    bias_p = bias.reshape(embed_dim, num_patches).T.reshape(N)

    x_in = x
    if compute_dtype is not None:
        wm = wm.astype(compute_dtype)
        x_in = x_in.astype(compute_dtype)

    tm, tn, tk = _pick_tiles(B, N, K)
    Bp, Np, Kp = _round_up(B, tm), _round_up(N, tn), _round_up(K, tk)

    # Zero-pad so every block is full; zeros cannot perturb the contraction.
    if (Bp, Kp) != (B, K):
        x_in = jnp.pad(x_in, ((0, Bp - B), (0, Kp - K)))
    if (Np, Kp) != (N, K):
        wm = jnp.pad(wm, ((0, Np - N), (0, Kp - K)))
    bias2d = bias_p.reshape(1, N)
    if Np != N:
        bias2d = jnp.pad(bias2d, ((0, 0), (0, Np - N)))

    grid = (Bp // tm, Np // tn, Kp // tk)

    # Double-buffered streams (x, w, bias, out) + f32 accumulator, with headroom.
    in_bytes = jnp.dtype(x_in.dtype).itemsize
    io_bytes = jnp.dtype(x.dtype).itemsize
    est = (2 * (tm * tk + tn * tk) * in_bytes
           + 2 * (tn + tm * tn) * io_bytes
           + tm * tn * 4)
    vmem_limit = int(min(56 * 2**20, max(32 * 2**20, 3 * est)))

    cost = pl.CostEstimate(
        flops=2 * Bp * Np * Kp,
        transcendentals=0,
        bytes_accessed=(Bp * Kp + (Bp // tm) * Np * Kp) * in_bytes
                       + (Bp * Np + Np) * io_bytes,
    )

    y = pl.pallas_call(
        _fe_kernel,
        out_shape=jax.ShapeDtypeStruct((Bp, Np), x.dtype),
        grid_spec=pltpu.PrefetchScalarGridSpec(
            num_scalar_prefetch=0,
            grid=grid,
            in_specs=[
                pl.BlockSpec((tm, tk), lambda i, j, k: (i, k)),   # x
                pl.BlockSpec((tn, tk), lambda i, j, k: (j, k)),   # masked+permuted weight
                pl.BlockSpec((1, tn), lambda i, j, k: (0, j)),    # bias (DMA'd once per j)
            ],
            out_specs=pl.BlockSpec((tm, tn), lambda i, j, k: (i, j)),
            scratch_shapes=[pltpu.VMEM((tm, tn), jnp.float32)],
        ),
        compiler_params=pltpu.CompilerParams(
            dimension_semantics=("parallel", "parallel", "arbitrary"),
            vmem_limit_bytes=vmem_limit,
        ),
        cost_estimate=cost,
    )(x_in, wm, bias2d)

    # Rows were pre-permuted, so this is a contiguous (free) reshape.
    y = y[:B, :N].reshape(B, num_patches, embed_dim)
    # norm_layer=None -> nn.Identity.
    # TODO(synk): an optional LayerNorm (norm_layer) could be fused as an epilogue on the
    # last K step, but the default module uses Identity so it is omitted.
    return y


def _reference(x, weight, mask_w, bias, num_patches, embed_dim):
    B = x.shape[0]
    y = x @ (weight * mask_w).T + bias
    return y.reshape(B, embed_dim, num_patches).transpose(0, 2, 1)


if __name__ == "__main__":
    key = jax.random.PRNGKey(0)

    # ---- primary test (tile-aligned shapes) ----
    B, num_genes, num_patches, embed_dim = 8, 256, 4, 32
    N = num_patches * embed_dim
    kx, kmask, kw, kb = jax.random.split(key, 4)

    x = jax.random.normal(kx, (B, num_genes), dtype=jnp.float32)
    # Binary gene->pathway mask (num_genes, num_patches), repeated per embed channel
    # exactly as the module does (np.repeat along axis=1), then nn.Linear layout (N, K).
    mask = (jax.random.uniform(kmask, (num_genes, num_patches)) < 0.3).astype(jnp.float32)
    mask_w = jnp.repeat(mask, embed_dim, axis=1).T          # (N, num_genes)
    weight = jax.random.normal(kw, (N, num_genes), dtype=jnp.float32) * 0.02
    bias = jax.random.normal(kb, (N,), dtype=jnp.float32) * 0.01

    out = feature_embed_forward(x, weight, mask_w, bias, num_patches, embed_dim)
    out = jax.block_until_ready(out)
    ref = _reference(x, weight, mask_w, bias, num_patches, embed_dim)
    assert out.shape == (B, num_patches, embed_dim)
    assert jnp.allclose(out, ref, rtol=1e-5, atol=1e-5)

    # ---- secondary test (non-divisible shapes exercise the padding path) ----
    B2, genes2, patches2, emb2 = 5, 200, 3, 24
    N2 = patches2 * emb2
    k1, k2, k3, k4 = jax.random.split(jax.random.PRNGKey(1), 4)
    x2 = jax.random.normal(k1, (B2, genes2), dtype=jnp.float32)
    mask2 = (jax.random.uniform(k2, (genes2, patches2)) < 0.3).astype(jnp.float32)
    mask_w2 = jnp.repeat(mask2, emb2, axis=1).T
    w2 = jax.random.normal(k3, (N2, genes2), dtype=jnp.float32) * 0.02
    b2 = jax.random.normal(k4, (N2,), dtype=jnp.float32) * 0.01

    out2 = jax.block_until_ready(
        feature_embed_forward(x2, w2, mask_w2, b2, patches2, emb2))
    ref2 = _reference(x2, w2, mask_w2, b2, patches2, emb2)
    assert out2.shape == (B2, patches2, emb2)
    assert jnp.allclose(out2, ref2, rtol=1e-5, atol=1e-5)

    print("KERNEL_OK")
</pallas_src>

<mosaic_0001>
module attributes {stable_mosaic.version = 11 : i64} {
  func.func @_fe_kernel(%arg0: i32, %arg1: i32, %arg2: i32, %arg3: memref<8x256xf32, #tpu.memory_space<vmem>>, %arg4: memref<128x256xf32, #tpu.memory_space<vmem>>, %arg5: memref<1x128xf32, #tpu.memory_space<vmem>>, %arg6: memref<8x128xf32, #tpu.memory_space<vmem>>, %arg7: memref<8x128xf32, #tpu.memory_space<vmem>>) attributes {dimension_semantics = [#tpu.dimension_semantics<parallel>, #tpu.dimension_semantics<parallel>, #tpu.dimension_semantics<arbitrary>], iteration_bounds = array<i64: 1, 1, 1>, scalar_prefetch = 0 : i64, scratch_operands = 1 : i64, tpu.core_type = #tpu.core_type<tc>, window_params = [{transform_indices = @transform_0, window_bounds = array<i64: 8, 256>}, {transform_indices = @transform_1, window_bounds = array<i64: 128, 256>}, {transform_indices = @transform_2, window_bounds = array<i64: 1, 128>}, {transform_indices = @transform_3, window_bounds = array<i64: 8, 128>}]} {
    %c0_i32 = arith.constant 0 : i32
    %0 = arith.cmpi eq, %arg2, %c0_i32 : i32
    %1 = arith.extui %0 : i1 to i32
    %c0_i32_0 = arith.constant 0 : i32
    %2 = arith.cmpi ne, %1, %c0_i32_0 : i32
    scf.if %2 {
      %cst_10 = arith.constant 0.000000e+00 : f32
      %12 = vector.broadcast %cst_10 : f32 to vector<8x128xf32>
      %c0_11 = arith.constant 0 : index
      %c0_12 = arith.constant 0 : index
      %13 = vector.load %arg7[%c0_11, %c0_12] : memref<8x128xf32, #tpu.memory_space<vmem>>, vector<8x128xf32>
      tpu.vector_store %arg7[%c0_11, %c0_12], %12 {strides = array<i32>} : memref<8x128xf32, #tpu.memory_space<vmem>>, vector<8x128xf32>,
    } else {
    }
    %c0 = arith.constant 0 : index
    %c0_1 = arith.constant 0 : index
    %3 = vector.load %arg7[%c0, %c0_1] : memref<8x128xf32, #tpu.memory_space<vmem>>, vector<8x128xf32>
    %c0_2 = arith.constant 0 : index
    %c0_3 = arith.constant 0 : index
    %4 = vector.load %arg3[%c0_2, %c0_3] : memref<8x256xf32, #tpu.memory_space<vmem>>, vector<8x256xf32>
    %c0_4 = arith.constant 0 : index
    %c0_5 = arith.constant 0 : index
    %5 = vector.load %arg4[%c0_4, %c0_5] : memref<128x256xf32, #tpu.memory_space<vmem>>, vector<128x256xf32>
    %cst = arith.constant dense<0.000000e+00> : vector<8x128xf32>
    %6 = tpu.matmul %4, %5, %cst {dimension_numbers = #tpu.dot_dimension_numbers<[1], [1], [0], [0], [0, 0, 1, 0], [], []>} : vector<8x256xf32>, vector<128x256xf32>, vector<8x128xf32> -> vector<8x128xf32>
    %7 = arith.addf %3, %6 : vector<8x128xf32>
    %c0_6 = arith.constant 0 : index
    %c0_7 = arith.constant 0 : index
    %8 = vector.load %arg7[%c0_6, %c0_7] : memref<8x128xf32, #tpu.memory_space<vmem>>, vector<8x128xf32>
    tpu.vector_store %arg7[%c0_6, %c0_7], %7 {strides = array<i32>} : memref<8x128xf32, #tpu.memory_space<vmem>>, vector<8x128xf32>,
    %c0_i32_8 = arith.constant 0 : i32
    %9 = arith.cmpi eq, %arg2, %c0_i32_8 : i32
    %10 = arith.extui %9 : i1 to i32
    %c0_i32_9 = arith.constant 0 : i32
    %11 = arith.cmpi ne, %10, %c0_i32_9 : i32
    scf.if %11 {
      %c0_10 = arith.constant 0 : index
      %c0_11 = arith.constant 0 : index
      %12 = vector.load %arg7[%c0_10, %c0_11] : memref<8x128xf32, #tpu.memory_space<vmem>>, vector<8x128xf32>
      %c0_12 = arith.constant 0 : index
      %c0_13 = arith.constant 0 : index
      %13 = vector.load %arg5[%c0_12, %c0_13] : memref<1x128xf32, #tpu.memory_space<vmem>>, vector<1x128xf32>
      %14 = vector.broadcast %13 : vector<1x128xf32> to vector<8x128xf32>
      %15 = arith.addf %12, %14 : vector<8x128xf32>
      %c0_14 = arith.constant 0 : index
      %c0_15 = arith.constant 0 : index
      %16 = vector.load %arg6[%c0_14, %c0_15] : memref<8x128xf32, #tpu.memory_space<vmem>>, vector<8x128xf32>
      tpu.vector_store %arg6[%c0_14, %c0_15], %15 {strides = array<i32>} : memref<8x128xf32, #tpu.memory_space<vmem>>, vector<8x128xf32>,
    } else {
    }
    return
  }
  func.func @transform_0(%arg0: i32, %arg1: i32, %arg2: i32) -> (i32, i32) {
    %c0_i32 = arith.constant 0 : i32
    return %arg0, %arg2 : i32, i32
  }
  func.func @transform_1(%arg0: i32, %arg1: i32, %arg2: i32) -> (i32, i32) {
    %c0_i32 = arith.constant 0 : i32
    return %arg1, %arg2 : i32, i32
  }
  func.func @transform_2(%arg0: i32, %arg1: i32, %arg2: i32) -> (i32, i32) {
    %c0_i32 = arith.constant 0 : i32
    %c0_i32_0 = arith.constant 0 : i32
    return %c0_i32, %arg1 : i32, i32
  }
  func.func @transform_3(%arg0: i32, %arg1: i32, %arg2: i32) -> (i32, i32) {
    %c0_i32 = arith.constant 0 : i32
    return %arg0, %arg1 : i32, i32
  }
}

</mosaic_0001>

<bundles_post_ra>
// kernel: mul.1
= control target key start
LH: loop header
LB: loop body
LE: loop exit
PB: predicated region body
PF: predicated region fallthrough
CT: control target
= control target key end

     0   :  { %3 = vsyncpa [#allocation1], 0  ;;  %s568_s0 = inlined_call_operand.hbm [shape: f32[128,256], index: 0, kind: input, shape index: {}]   ;;  %s569_s1 = inlined_call_operand.hbm [shape: f32[128,256], index: 1, kind: input, shape index: {}]   ;;  %s570_s2 = inlined_call_operand.vmem [shape: f32[128,256], index: 2, kind: output, shape index: {}]  }
   0x1   :  { %4 = vsyncpa [#allocation3], 0  ;;  %s429_s9 = smov [#allocation0]   ;;  %s381_s13 = scalar_lea.hbm %s568_s0, 4096 }
   0x2   :  { %s8_s10 = sshll.u32 %s429_s9, 4  ;;  %p382_p0 = scmp.ne.s32.totalorder %s568_s0, %s381_s13  ;;  %s9_s10 = int_to_ptr.vmem [resolvable:$true] %s8_s10 }
   0x3   :  { %p385_p1 = scmp.lt.u32.totalorder %s381_s13, %s568_s0 }
   0x5   :  { %p387_p2 = pnand %p385_p1, %p382_p0 }
   0x7   :  { %390 = shalt.err (!%p387_p2)
}
   0x8   :  { %s391_s18 = scalar_lea.vmem %s9_s10, 4096  ;;  %p396_p4 = scmp.lt.s32.totalorder %s9_s10, %s9_s10 }
   0x9   :  { %p392_p3 = scmp.ne.s32.totalorder %s9_s10, %s391_s18  ;;  %p397_p5 = scmp.lt.s32.totalorder %s391_s18, %s391_s18 }
   0xb   :  { %p398_p6 = por %p397_p5, %p396_p4 }
   0xd   :  { %p399_p7 = pnand %p398_p6, %p392_p3 }
   0xf   :  { %402 = shalt.err (!%p399_p7)
}
  0x10   :  { %s430_s19 = smov 256   ;;  %s431_s20 = smov 16  }
  0x11   :  { %14 = dma.hbm_to_vmem [thread:$0]  %s568_s0, 4096, %s9_s10, [#allocation1], %s430_s19, %s430_s19, %s431_s20  }
  0x12   :  { %s432_s0 = smov [#allocation2]   ;;  %s403_s26 = scalar_lea.hbm %s569_s1, 4096 }
  0x13   :  { %s18_s23 = sshll.u32 %s432_s0, 4  ;;  %p404_p8 = scmp.ne.s32.totalorder %s569_s1, %s403_s26  ;;  %s19_s23 = int_to_ptr.vmem [resolvable:$true] %s18_s23 }
  0x14   :  { %p407_p9 = scmp.lt.u32.totalorder %s403_s26, %s569_s1 }
  0x16   :  { %p409_p10 = pnand %p407_p9, %p404_p8 }
  0x18   :  { %412 = shalt.err (!%p409_p10)
}
  0x19   :  { %s413_s3 = scalar_lea.vmem %s19_s23, 4096  ;;  %p418_p12 = scmp.lt.s32.totalorder %s19_s23, %s19_s23 }
  0x1a   :  { %p414_p11 = scmp.ne.s32.totalorder %s19_s23, %s413_s3  ;;  %p419_p13 = scmp.lt.s32.totalorder %s413_s3, %s413_s3 }
  0x1c   :  { %p420_p0 = por %p419_p13, %p418_p12 }
  0x1e   :  { %p421_p1 = pnand %p420_p0, %p414_p11 }
  0x20   :  { %424 = shalt.err (!%p421_p1)
}
  0x21   :  { %24 = dma.hbm_to_vmem [thread:$0]  %s569_s1, 4096, %s19_s23, [#allocation3], %s430_s19, %s430_s19, %s431_s20  }
  0x22   :  { %425 = dma.done.wait [#allocation1], 4096  }
  0x23   :  { %426 = vsyncadd [#allocation1], 4294963200 }
  0x24   :  { %427 = dma.done.wait [#allocation3], 4096  }
  0x25   :  { %428 = vsyncadd [#allocation3], 4294963200  ;;  %v27_v0 = vld [vmem:[#allocation0] sm:$0xff]  ;;  %v35_v2 = vld [vmem:[#allocation0 + $0x10] sm:$0xff] }
  0x26   :  { %v28_v1 = vld [vmem:[#allocation2] sm:$0xff]  ;;  %v37_v4 = vld [vmem:[#allocation2 + $0x10] sm:$0xff]  ;;  %v185_v47 = vld [vmem:[#allocation0 + $0x8] sm:$0xff] }
  0x27   :  { %v31_v3 = vmul.f32 %v28_v1, %v27_v0  ;;  %v45_v5 = vld [vmem:[#allocation0 + $0x20] sm:$0xff]  ;;  %v40_v7 = vmul.f32 %v37_v4, %v35_v2  ;;  %v55_v9 = vld [vmem:[#allocation0 + $0x30] sm:$0xff]  ;;  %v187_v49 = vld [vmem:[#allocation2 + $0x8] sm:$0xff] }
  0x28   :  { %v47_v6 = vld [vmem:[#allocation2 + $0x20] sm:$0xff]  ;;  %v57_v10 = vld [vmem:[#allocation2 + $0x30] sm:$0xff]  ;;  %v195_v50 = vld [vmem:[#allocation0 + $0x18] sm:$0xff]  ;;  %v190_v52 = vmul.f32 %v187_v49, %v185_v47 }
  0x29   :  { %v50_v8 = vmul.f32 %v47_v6, %v45_v5  ;;  %v65_v11 = vld [vmem:[#allocation0 + $0x40] sm:$0xff]  ;;  %33 = vst [vmem:[%s570_s2] sm:$0xff] %v31_v3  ;;  %v60_v12 = vmul.f32 %v57_v10, %v55_v9  ;;  %v75_v14 = vld [vmem:[#allocation0 + $0x50] sm:$0xff]  ;;  %346 = vst [vmem:[%s570_s2 + $0x10] sm:$0xff] %v40_v7 }
  0x2a   :  { %v67_v13 = vld [vmem:[#allocation2 + $0x40] sm:$0xff]  ;;  %v77_v15 = vld [vmem:[#allocation2 + $0x50] sm:$0xff]  ;;  %v197_v51 = vld [vmem:[#allocation2 + $0x18] sm:$0xff]  ;;  %361 = vst [vmem:[%s570_s2 + $0x8] sm:$0xff] %v190_v52 }
  0x2b   :  { %347 = vst [vmem:[%s570_s2 + $0x20] sm:$0xff] %v50_v8  ;;  %v70_v16 = vmul.f32 %v67_v13, %v65_v11  ;;  %v80_v17 = vmul.f32 %v77_v15, %v75_v14  ;;  %v85_v18 = vld [vmem:[#allocation0 + $0x60] sm:$0xff]  ;;  %v95_v20 = vld [vmem:[#allocation0 + $0x70] sm:$0xff]  ;;  %348 = vst [vmem:[%s570_s2 + $0x30] sm:$0xff] %v60_v12  ;;  %v200_v53 = vmul.f32 %v197_v51, %v195_v50 }
  0x2c   :  { %v87_v19 = vld [vmem:[#allocation2 + $0x60] sm:$0xff]  ;;  %v97_v22 = vld [vmem:[#allocation2 + $0x70] sm:$0xff]  ;;  %v205_v54 = vld [vmem:[#allocation0 + $0x28] sm:$0xff] }
  0x2d   :  { %v90_v21 = vmul.f32 %v87_v19, %v85_v18  ;;  %v105_v23 = vld [vmem:[#allocation0 + $0x80] sm:$0xff]  ;;  %349 = vst [vmem:[%s570_s2 + $0x40] sm:$0xff] %v70_v16  ;;  %350 = vst [vmem:[%s570_s2 + $0x50] sm:$0xff] %v80_v17  ;;  %v100_v25 = vmul.f32 %v97_v22, %v95_v20  ;;  %v115_v27 = vld [vmem:[#allocation0 + $0x90] sm:$0xff] }
  0x2e   :  { %v107_v24 = vld [vmem:[#allocation2 + $0x80] sm:$0xff]  ;;  %v117_v28 = vld [vmem:[#allocation2 + $0x90] sm:$0xff]  ;;  %v207_v55 = vld [vmem:[#allocation2 + $0x28] sm:$0xff]  ;;  %362 = vst [vmem:[%s570_s2 + $0x18] sm:$0xff] %v200_v53 }
  0x2f   :  { %v110_v26 = vmul.f32 %v107_v24, %v105_v23  ;;  %v125_v29 = vld [vmem:[#allocation0 + $0xa0] sm:$0xff]  ;;  %351 = vst [vmem:[%s570_s2 + $0x60] sm:$0xff] %v90_v21  ;;  %v120_v30 = vmul.f32 %v117_v28, %v115_v27  ;;  %v135_v32 = vld [vmem:[#allocation0 + $0xb0] sm:$0xff]  ;;  %352 = vst [vmem:[%s570_s2 + $0x70] sm:$0xff] %v100_v25  ;;  %v210_v57 = vmul.f32 %v207_v55, %v205_v54 }
  0x30   :  { %v127_v31 = vld [vmem:[#allocation2 + $0xa0] sm:$0xff]  ;;  %v137_v33 = vld [vmem:[#allocation2 + $0xb0] sm:$0xff]  ;;  %v215_v56 = vld [vmem:[#allocation0 + $0x38] sm:$0xff] }
  0x31   :  { %353 = vst [vmem:[%s570_s2 + $0x80] sm:$0xff] %v110_v26  ;;  %v130_v34 = vmul.f32 %v127_v31, %v125_v29  ;;  %v140_v35 = vmul.f32 %v137_v33, %v135_v32  ;;  %v145_v36 = vld [vmem:[#allocation0 + $0xc0] sm:$0xff]  ;;  %v155_v38 = vld [vmem:[#allocation0 + $0xd0] sm:$0xff]  ;;  %354 = vst [vmem:[%s570_s2 + $0x90] sm:$0xff] %v120_v30 }
  0x32   :  { %v147_v37 = vld [vmem:[#allocation2 + $0xc0] sm:$0xff]  ;;  %v157_v40 = vld [vmem:[#allocation2 + $0xd0] sm:$0xff]  ;;  %v217_v58 = vld [vmem:[#allocation2 + $0x38] sm:$0xff]  ;;  %363 = vst [vmem:[%s570_s2 + $0x28] sm:$0xff] %v210_v57 }
  0x33   :  { %v150_v39 = vmul.f32 %v147_v37, %v145_v36  ;;  %v165_v41 = vld [vmem:[#allocation0 + $0xe0] sm:$0xff]  ;;  %355 = vst [vmem:[%s570_s2 + $0xa0] sm:$0xff] %v130_v34  ;;  %356 = vst [vmem:[%s570_s2 + $0xb0] sm:$0xff] %v140_v35  ;;  %v160_v43 = vmul.f32 %v157_v40, %v155_v38  ;;  %v175_v45 = vld [vmem:[#allocation0 + $0xf0] sm:$0xff]  ;;  %v220_v61 = vmul.f32 %v217_v58, %v215_v56 }
  0x34   :  { %v167_v42 = vld [vmem:[#allocation2 + $0xe0] sm:$0xff]  ;;  %v177_v46 = vld [vmem:[#allocation2 + $0xf0] sm:$0xff]  ;;  %v225_v59 = vld [vmem:[#allocation0 + $0x48] sm:$0xff] }
  0x35   :  { %v170_v44 = vmul.f32 %v167_v42, %v165_v41  ;;  %357 = vst [vmem:[%s570_s2 + $0xc0] sm:$0xff] %v150_v39  ;;  %v180_v48 = vmul.f32 %v177_v46, %v175_v45  ;;  %358 = vst [vmem:[%s570_s2 + $0xd0] sm:$0xff] %v160_v43  ;;  %v227_v60 = vld [vmem:[#allocation2 + $0x48] sm:$0xff]  ;;  %v235_v63 = vld [vmem:[#allocation0 + $0x58] sm:$0xff] }
  0x36   :  { %v230_v62 = vmul.f32 %v227_v60, %v225_v59  ;;  %v237_v0 = vld [vmem:[#allocation2 + $0x58] sm:$0xff]  ;;  %v245_v1 = vld [vmem:[#allocation0 + $0x68] sm:$0xff]  ;;  %364 = vst [vmem:[%s570_s2 + $0x38] sm:$0xff] %v220_v61 }
  0x37   :  { %359 = vst [vmem:[%s570_s2 + $0xe0] sm:$0xff] %v170_v44  ;;  %360 = vst [vmem:[%s570_s2 + $0xf0] sm:$0xff] %v180_v48  ;;  %v240_v2 = vmul.f32 %v237_v0, %v235_v63  ;;  %v247_v3 = vld [vmem:[#allocation2 + $0x68] sm:$0xff]  ;;  %v255_v4 = vld [vmem:[#allocation0 + $0x78] sm:$0xff] }
  0x38   :  { %v257_v5 = vld [vmem:[#allocation2 + $0x78] sm:$0xff]  ;;  %365 = vst [vmem:[%s570_s2 + $0x48] sm:$0xff] %v230_v62  ;;  %v250_v6 = vmul.f32 %v247_v3, %v245_v1  ;;  %v265_v8 = vld [vmem:[#allocation0 + $0x88] sm:$0xff] }
  0x39   :  { %v260_v7 = vmul.f32 %v257_v5, %v255_v4  ;;  %v267_v9 = vld [vmem:[#allocation2 + $0x88] sm:$0xff]  ;;  %v275_v10 = vld [vmem:[#allocation0 + $0x98] sm:$0xff]  ;;  %366 = vst [vmem:[%s570_s2 + $0x58] sm:$0xff] %v240_v2 }
  0x3a   :  { %v270_v11 = vmul.f32 %v267_v9, %v265_v8  ;;  %v277_v12 = vld [vmem:[#allocation2 + $0x98] sm:$0xff]  ;;  %v285_v13 = vld [vmem:[#allocation0 + $0xa8] sm:$0xff]  ;;  %367 = vst [vmem:[%s570_s2 + $0x68] sm:$0xff] %v250_v6 }
  0x3b   :  { %v287_v14 = vld [vmem:[#allocation2 + $0xa8] sm:$0xff]  ;;  %368 = vst [vmem:[%s570_s2 + $0x78] sm:$0xff] %v260_v7  ;;  %v280_v15 = vmul.f32 %v277_v12, %v275_v10  ;;  %v295_v17 = vld [vmem:[#allocation0 + $0xb8] sm:$0xff] }
  0x3c   :  { %v290_v16 = vmul.f32 %v287_v14, %v285_v13  ;;  %v297_v18 = vld [vmem:[#allocation2 + $0xb8] sm:$0xff]  ;;  %v305_v19 = vld [vmem:[#allocation0 + $0xc8] sm:$0xff]  ;;  %369 = vst [vmem:[%s570_s2 + $0x88] sm:$0xff] %v270_v11 }
  0x3d   :  { %v300_v20 = vmul.f32 %v297_v18, %v295_v17  ;;  %v307_v21 = vld [vmem:[#allocation2 + $0xc8] sm:$0xff]  ;;  %v315_v22 = vld [vmem:[#allocation0 + $0xd8] sm:$0xff]  ;;  %370 = vst [vmem:[%s570_s2 + $0x98] sm:$0xff] %v280_v15 }
  0x3e   :  { %v317_v23 = vld [vmem:[#allocation2 + $0xd8] sm:$0xff]  ;;  %371 = vst [vmem:[%s570_s2 + $0xa8] sm:$0xff] %v290_v16  ;;  %v310_v24 = vmul.f32 %v307_v21, %v305_v19  ;;  %v325_v26 = vld [vmem:[#allocation0 + $0xe8] sm:$0xff] }
  0x3f   :  { %v320_v25 = vmul.f32 %v317_v23, %v315_v22  ;;  %v327_v27 = vld [vmem:[#allocation2 + $0xe8] sm:$0xff]  ;;  %v335_v28 = vld [vmem:[#allocation0 + $0xf8] sm:$0xff]  ;;  %372 = vst [vmem:[%s570_s2 + $0xb8] sm:$0xff] %v300_v20 }
  0x40   :  { %v330_v29 = vmul.f32 %v327_v27, %v325_v26  ;;  %v337_v30 = vld [vmem:[#allocation2 + $0xf8] sm:$0xff]  ;;  %373 = vst [vmem:[%s570_s2 + $0xc8] sm:$0xff] %v310_v24 }
  0x41   :  { %374 = vst [vmem:[%s570_s2 + $0xd8] sm:$0xff] %v320_v25  ;;  %v340_v31 = vmul.f32 %v337_v30, %v335_v28 }
  0x42   :  { %375 = vst [vmem:[%s570_s2 + $0xe8] sm:$0xff] %v330_v29 }
  0x43   :  { %376 = vst [vmem:[%s570_s2 + $0xf8] sm:$0xff] %v340_v31 }
  0x44   :  { %344 = vsyncpa [#allocation1], 1 }
  0x45   :  { %345 = vsyncpa [#allocation3], 1 }

// kernel: feature_embed_forward.1
= control target key start
LH: loop header
LB: loop body
LE: loop exit
PB: predicated region body
PF: predicated region fallthrough
CT: control target
= control target key end

     0   :  { %s304_s1 = inlined_call_operand.vmem [shape: f32[128,256], index: 1, kind: input, shape index: {}]   ;;  %s305_s0 = inlined_call_operand.vmem [shape: f32[8,256], index: 0, kind: input, shape index: {}]   ;;  %s306_s2 = inlined_call_operand.vmem [shape: f32[1,128], index: 2, kind: input, shape index: {}]   ;;  %s307_s3 = inlined_call_operand.vmem [shape: f32[8,128], index: 3, kind: output, shape index: {}]  }
   0x1   :  { %v23_v0 = vld [vmem:[%s304_s1 + $0x8] sm:$0xff]  ;;  %v25_v1 = vld [vmem:[%s304_s1 + $0x18] sm:$0xff]  ;;  %v22_v2 = vld [vmem:[%s304_s1] sm:$0xff] }
   0x2   :  { %v144_v3 = vpack.c.bf16 %v25_v1, %v23_v0  ;;  %v24_v4 = vld [vmem:[%s304_s1 + $0x10] sm:$0xff]  ;;  %v27_v5 = vld [vmem:[%s304_s1 + $0x28] sm:$0xff]  ;;  %v29_v6 = vld [vmem:[%s304_s1 + $0x38] sm:$0xff] }
   0x3   :  { %v146_v7 = vpack.c.bf16 %v24_v4, %v22_v2  ;;  %v148_v8 = vpack.c.bf16 %v29_v6, %v27_v5  ;;  %v26_v9 = vld [vmem:[%s304_s1 + $0x20] sm:$0xff]  ;;  %v28_v10 = vld [vmem:[%s304_s1 + $0x30] sm:$0xff]  ;;  %v31_v11 = vld [vmem:[%s304_s1 + $0x48] sm:$0xff] }
   0x4   :  { %145 = vmatprep.subr.bf16.mxu0 %v144_v3  ;;  %v33_v12 = vld [vmem:[%s304_s1 + $0x58] sm:$0xff]  ;;  %v150_v13 = vpack.c.bf16 %v28_v10, %v26_v9  ;;  %v21_v15 = vld [vmem:[%s305_s0 + $0x8] sm:$0xff]  ;;  %v30_v16 = vld [vmem:[%s304_s1 + $0x40] sm:$0xff] }
   0x5   :  { %147 = vmatpush1.bf16.xpose.msra.mxu0 %v146_v7  ;;  %v152_v14 = vpack.c.bf16 %v33_v12, %v31_v11  ;;  %118 = vmatprep.mubr.f32.mxu0 %v21_v15  ;;  %v32_v17 = vld [vmem:[%s304_s1 + $0x50] sm:$0xff]  ;;  %v35_v18 = vld [vmem:[%s304_s1 + $0x68] sm:$0xff]  ;;  %v37_v19 = vld [vmem:[%s304_s1 + $0x78] sm:$0xff] }
   0x6   :  { %149 = vmatprep.subr.bf16.mxu0 %v148_v8  ;;  %v154_v20 = vpack.c.bf16 %v32_v17, %v30_v16  ;;  %v156_v21 = vpack.c.bf16 %v37_v19, %v35_v18  ;;  %v34_v22 = vld [vmem:[%s304_s1 + $0x60] sm:$0xff]  ;;  %v36_v23 = vld [vmem:[%s304_s1 + $0x70] sm:$0xff]  ;;  %v39_v24 = vld [vmem:[%s304_s1 + $0x88] sm:$0xff] }
   0x7   :  { %v41_v25 = vld [vmem:[%s304_s1 + $0x98] sm:$0xff]  ;;  %v158_v26 = vpack.c.bf16 %v36_v23, %v34_v22  ;;  %v38_v28 = vld [vmem:[%s304_s1 + $0x80] sm:$0xff]  ;;  %v40_v29 = vld [vmem:[%s304_s1 + $0x90] sm:$0xff] }
   0x8   :  { %v160_v27 = vpack.c.bf16 %v41_v25, %v39_v24  ;;  %v43_v30 = vld [vmem:[%s304_s1 + $0xa8] sm:$0xff]  ;;  %v45_v31 = vld [vmem:[%s304_s1 + $0xb8] sm:$0xff]  ;;  %v162_v32 = vpack.c.bf16 %v40_v29, %v38_v28  ;;  %v42_v34 = vld [vmem:[%s304_s1 + $0xa0] sm:$0xff] }
   0x9   :  { %v164_v33 = vpack.c.bf16 %v45_v31, %v43_v30  ;;  %v44_v35 = vld [vmem:[%s304_s1 + $0xb0] sm:$0xff]  ;;  %v47_v36 = vld [vmem:[%s304_s1 + $0xc8] sm:$0xff]  ;;  %v49_v37 = vld [vmem:[%s304_s1 + $0xd8] sm:$0xff] }
   0xa   :  { %v166_v38 = vpack.c.bf16 %v44_v35, %v42_v34  ;;  %v168_v39 = vpack.c.bf16 %v49_v37, %v47_v36  ;;  %v46_v40 = vld [vmem:[%s304_s1 + $0xc0] sm:$0xff]  ;;  %v48_v41 = vld [vmem:[%s304_s1 + $0xd0] sm:$0xff]  ;;  %v51_v42 = vld [vmem:[%s304_s1 + $0xe8] sm:$0xff] }
   0xb   :  { %v53_v43 = vld [vmem:[%s304_s1 + $0xf8] sm:$0xff]  ;;  %v170_v44 = vpack.c.bf16 %v48_v41, %v46_v40  ;;  %v50_v46 = vld [vmem:[%s304_s1 + $0xe0] sm:$0xff]  ;;  %v52_v47 = vld [vmem:[%s304_s1 + $0xf0] sm:$0xff] }
   0xc   :  { %v172_v45 = vpack.c.bf16 %v53_v43, %v51_v42  ;;  %v174_v48 = vpack.c.bf16 %v52_v47, %v50_v46  ;;  %v20_v49 = vld [vmem:[%s305_s0] sm:$0xff] }
   0xd   :  { %151 = vmatpush1.bf16.xpose.msra.mxu0 %v150_v13  ;;  %v143_v50 = vld [vmem:[%s306_s2] ss:$0 sm:$0xff] }
   0xe   :  { %153 = vmatprep.subr.bf16.mxu0 %v152_v14 }
  0x15   :  { %155 = vmatpush1.bf16.xpose.msra.mxu0 %v154_v20 }
  0x16   :  { %157 = vmatprep.subr.bf16.mxu0 %v156_v21 }
  0x1d   :  { %159 = vmatpush1.bf16.xpose.msra.mxu0 %v158_v26 }
  0x1e   :  { %161 = vmatprep.subr.bf16.mxu0 %v160_v27 }
  0x25   :  { %163 = vmatpush1.bf16.xpose.msra.mxu0 %v162_v32 }
  0x26   :  { %165 = vmatprep.subr.bf16.mxu0 %v164_v33 }
  0x2d   :  { %167 = vmatpush1.bf16.xpose.msra.mxu0 %v166_v38 }
  0x2e   :  { %169 = vmatprep.subr.bf16.mxu0 %v168_v39 }
  0x35   :  { %171 = vmatpush1.bf16.xpose.msra.mxu0 %v170_v44 }
  0x36   :  { %173 = vmatprep.subr.bf16.mxu0 %v172_v45 }
  0x3d   :  { %175 = vmatpush1.bf16.xpose.msra.mxu0 %v174_v48 }
  0x44   :  { %119 = vmatmul.mubr.f32.vlgmr.msra.gmra.mrb[0].mxu0 %v20_v49 }
 0x117   :  { %v120_v51 = vpop.f32.mrb[0].mxu0 }
 0x118   :  { %v137_v52 = vadd.f32 %v143_v50, %v120_v51  ;;  %v122_v53 = vpop.f32.mrb[1].mxu0 }
 0x11a   :  { %138 = vst [vmem:[%s307_s3] sm:$0xff] %v137_v52 }

</bundles_post_ra>
